<compile_context>
chip_gen: v5e
topology: v5e:2x2
jax: 0.10.0
libtpu: 0.0.40
codegen_flags: <defaults>
</compile_context>

<pallas_src>
import functools

import jax
import jax.numpy as jnp
from jax.experimental import pallas as pl
from jax.experimental.pallas import tpu as pltpu


# ----------------------------------------------------------------------------
# Tiled dense matmul (+ bias in the epilogue) over the flattened token dim.
# ----------------------------------------------------------------------------
def _pick_tile(dim, cap, align):
    """Largest aligned tile <= cap that divides dim; fall back to the full dim."""
    if dim <= cap:
        return dim
    t = (cap // align) * align
    while t >= align:
        if dim % t == 0:
            return t
        t -= align
    return dim


def _matmul_bias_kernel(x_ref, w_ref, b_ref, o_ref, acc_ref):
    @pl.when(pl.program_id(2) == 0)
    def _init():
        acc_ref[...] = jnp.zeros_like(acc_ref)

    acc_ref[...] += jnp.dot(
        x_ref[...], w_ref[...], preferred_element_type=jnp.float32
    )

    # Bias + writeback only once, after the K reduction is done.
    @pl.when(pl.program_id(2) == pl.num_programs(2) - 1)
    def _finalize():
        o_ref[...] = (acc_ref[...] + b_ref[...].astype(jnp.float32)).astype(
            o_ref.dtype
        )


def matmul_bias(x, w, b, *, tm_cap=256, tn_cap=256, tk_cap=512):
    """x: (M, K), w: (K, N) (already (in, out) layout), b: (1, N) -> (M, N)."""
    M, K = x.shape
    N = w.shape[1]
    tm = _pick_tile(M, tm_cap, 8)      # sublane dim of x / out tiles
    tn = _pick_tile(N, tn_cap, 128)    # lane dim of w / out tiles
    tk = _pick_tile(K, tk_cap, 128)    # lane dim of x tile, sublane dim of w tile
    grid = (M // tm, N // tn, K // tk)
    return pl.pallas_call(
        _matmul_bias_kernel,
        out_shape=jax.ShapeDtypeStruct((M, N), x.dtype),
        grid=grid,
        in_specs=[
            pl.BlockSpec((tm, tk), lambda i, j, k: (i, k)),
            pl.BlockSpec((tk, tn), lambda i, j, k: (k, j)),
            pl.BlockSpec((1, tn), lambda i, j, k: (0, j)),
        ],
        out_specs=pl.BlockSpec((tm, tn), lambda i, j, k: (i, j)),
        scratch_shapes=[pltpu.VMEM((tm, tn), jnp.float32)],
        compiler_params=pltpu.CompilerParams(
            dimension_semantics=("parallel", "parallel", "arbitrary")
        ),
    )(x, w, b)


# ----------------------------------------------------------------------------
# Attention: one grid step per (batch, q-tile); all heads handled in-step.
#   q comes straight from x1 (B, N, C); k/v are lane slices of the kv output
#   (B, N, 2C); output is written directly in (B, N, C) layout.
# ----------------------------------------------------------------------------
def _attn_kernel(q_ref, kv_ref, o_ref, *, num_heads, head_dim, scale):
    C = num_heads * head_dim
    for h in range(num_heads):                       # static unroll over heads
        lo = h * head_dim
        hi = lo + head_dim
        # Fold the softmax scale into q (cheaper than scaling the (tq, N) scores).
        q = q_ref[:, lo:hi].astype(jnp.float32) * scale     # (tq, D)
        k = kv_ref[:, lo:hi].astype(jnp.float32)            # (N, D)
        v = kv_ref[:, C + lo:C + hi].astype(jnp.float32)    # (N, D)

        # scores: (tq, N) = q @ k^T (contract head_dim, no materialized k.T)
        s = jax.lax.dot_general(
            q, k, (((1,), (1,)), ((), ())), preferred_element_type=jnp.float32
        )
        s = s - jnp.max(s, axis=-1, keepdims=True)
        p = jnp.exp(s)
        # Defer normalization: fold 1/l into the (tq, D) PV result; reciprocal
        # runs on the EUP slot.
        inv_l = pl.reciprocal(jnp.sum(p, axis=-1, keepdims=True), approx=True)
        o = jnp.dot(p, v, preferred_element_type=jnp.float32) * inv_l
        o_ref[:, lo:hi] = o.astype(o_ref.dtype)


def attention(x1, kv, *, num_heads, scale):
    """x1: (B, N, C) query source, kv: (B, N, 2C) -> (B, N, C)."""
    B, N, C = x1.shape
    head_dim = C // num_heads
    tq = 128 if (N > 128 and N % 128 == 0) else N
    grid = (B, N // tq)
    return pl.pallas_call(
        functools.partial(
            _attn_kernel, num_heads=num_heads, head_dim=head_dim, scale=scale
        ),
        out_shape=jax.ShapeDtypeStruct((B, N, C), x1.dtype),
        grid=grid,
        in_specs=[
            pl.BlockSpec((pl.Squeezed(), tq, C), lambda b, qi: (b, qi, 0)),
            pl.BlockSpec((pl.Squeezed(), N, 2 * C), lambda b, qi: (b, 0, 0)),
        ],
        out_specs=pl.BlockSpec((pl.Squeezed(), tq, C), lambda b, qi: (b, qi, 0)),
        compiler_params=pltpu.CompilerParams(
            dimension_semantics=("parallel", "parallel")
        ),
    )(x1, kv)


# ----------------------------------------------------------------------------
# Module wrapper
# ----------------------------------------------------------------------------
class CrossAttentionPallas:
    def __init__(self, dim, num_heads=8, qkv_bias=False, key=None):
        assert dim % num_heads == 0
        self.dim = dim
        self.num_heads = num_heads
        self.head_dim = dim // num_heads
        self.scale = self.head_dim ** (-0.5)

        key = jax.random.PRNGKey(42) if key is None else key
        k1, k2, k3 = jax.random.split(key, 3)
        # Weights stored pre-transposed (in_features, out_features): no w.T in
        # the forward pass. (nn.Linear weight is (out, in); this is weight.T.)
        self.w_kv = 0.02 * jax.random.normal(k1, (dim, 2 * dim), jnp.float32)
        self.b_kv = jnp.zeros((1, 2 * dim), jnp.float32)  # qkv_bias=False
        self.w_proj = 0.02 * jax.random.normal(k2, (dim, dim), jnp.float32)
        self.b_proj = 0.02 * jax.random.normal(k3, (1, dim), jnp.float32)

    def __call__(self, x):
        # x: (2, B, N, C) stacked [x1 (query source), x2 (key/value source)]
        x1, x2 = x[0], x[1]
        B, N, C = x1.shape

        # kv = Linear(x2): (B*N, C) @ (C, 2C) + b   [tiled Pallas matmul]
        kv = matmul_bias(x2.reshape(B * N, C), self.w_kv, self.b_kv)
        kv = kv.reshape(B, N, 2 * C)  # contiguous reshape, no data movement

        # attention (q from x1, k/v sliced from kv, output already (B, N, C))
        o = attention(x1, kv, num_heads=self.num_heads, scale=self.scale)

        # output projection   [tiled Pallas matmul]
        out = matmul_bias(o.reshape(B * N, C), self.w_proj, self.b_proj)
        return out.reshape(B, N, C)

    # pure-JAX reference (exact softmax) for validation
    def reference(self, x):
        x1, x2 = x[0], x[1]
        B, N, C = x1.shape
        H, D = self.num_heads, self.head_dim
        q = x1.reshape(B, N, H, D).transpose(0, 2, 1, 3)
        kv = (x2.reshape(B * N, C) @ self.w_kv + self.b_kv).reshape(
            B, N, 2, H, D
        ).transpose(2, 0, 3, 1, 4)
        k, v = kv[0], kv[1]
        attn = jnp.einsum("bhqd,bhkd->bhqk", q, k) * self.scale
        attn = jax.nn.softmax(attn, axis=-1)
        o = jnp.einsum("bhqk,bhkd->bhqd", attn, v)
        o = o.transpose(0, 2, 1, 3).reshape(B, N, C)
        return o @ self.w_proj + self.b_proj


if __name__ == "__main__":
    B, N, C, H = 2, 16, 64, 8
    key = jax.random.PRNGKey(0)
    kx, kp = jax.random.split(key)
    x = jax.random.normal(kx, (2, B, N, C), jnp.float32)  # stacked [x1, x2]

    mod = CrossAttentionPallas(dim=C, num_heads=H, qkv_bias=False, key=kp)

    out = jax.block_until_ready(mod(x))
    ref = mod.reference(x)

    assert out.shape == (B, N, C)
    err = float(jnp.max(jnp.abs(out - ref)))
    # approx reciprocal in the softmax costs a little relative accuracy
    assert err < 2e-3, err
    print("KERNEL_OK")
</pallas_src>

<mosaic_0001>
module attributes {stable_mosaic.version = 11 : i64} {
  func.func @_matmul_bias_kernel(%arg0: i32, %arg1: i32, %arg2: i32, %arg3: memref<32x64xf32, #tpu.memory_space<vmem>>, %arg4: memref<64x128xf32, #tpu.memory_space<vmem>>, %arg5: memref<1x128xf32, #tpu.memory_space<vmem>>, %arg6: memref<32x128xf32, #tpu.memory_space<vmem>>, %arg7: memref<32x128xf32, #tpu.memory_space<vmem>>) attributes {dimension_semantics = [#tpu.dimension_semantics<parallel>, #tpu.dimension_semantics<parallel>, #tpu.dimension_semantics<arbitrary>], iteration_bounds = array<i64: 1, 1, 1>, scalar_prefetch = 0 : i64, scratch_operands = 1 : i64, tpu.core_type = #tpu.core_type<tc>, window_params = [{transform_indices = @transform_0, window_bounds = array<i64: 32, 64>}, {transform_indices = @transform_1, window_bounds = array<i64: 64, 128>}, {transform_indices = @transform_2, window_bounds = array<i64: 1, 128>}, {transform_indices = @transform_3, window_bounds = array<i64: 32, 128>}]} {
    %c0_i32 = arith.constant 0 : i32
    %0 = arith.cmpi eq, %arg2, %c0_i32 : i32
    %1 = arith.extui %0 : i1 to i32
    %c0_i32_0 = arith.constant 0 : i32
    %2 = arith.cmpi ne, %1, %c0_i32_0 : i32
    scf.if %2 {
      %cst_10 = arith.constant 0.000000e+00 : f32
      %12 = vector.broadcast %cst_10 : f32 to vector<32x128xf32>
      %c0_11 = arith.constant 0 : index
      %c0_12 = arith.constant 0 : index
      %13 = vector.load %arg7[%c0_11, %c0_12] : memref<32x128xf32, #tpu.memory_space<vmem>>, vector<32x128xf32>
      tpu.vector_store %arg7[%c0_11, %c0_12], %12 {strides = array<i32>} : memref<32x128xf32, #tpu.memory_space<vmem>>, vector<32x128xf32>,
    } else {
    }
    %c0 = arith.constant 0 : index
    %c0_1 = arith.constant 0 : index
    %3 = vector.load %arg7[%c0, %c0_1] : memref<32x128xf32, #tpu.memory_space<vmem>>, vector<32x128xf32>
    %c0_2 = arith.constant 0 : index
    %c0_3 = arith.constant 0 : index
    %4 = vector.load %arg3[%c0_2, %c0_3] : memref<32x64xf32, #tpu.memory_space<vmem>>, vector<32x64xf32>
    %c0_4 = arith.constant 0 : index
    %c0_5 = arith.constant 0 : index
    %5 = vector.load %arg4[%c0_4, %c0_5] : memref<64x128xf32, #tpu.memory_space<vmem>>, vector<64x128xf32>
    %cst = arith.constant dense<0.000000e+00> : vector<32x128xf32>
    %6 = tpu.matmul %4, %5, %cst {dimension_numbers = #tpu.dot_dimension_numbers<[1], [0], [0], [1], [0, 0, 1, 1], [], []>} : vector<32x64xf32>, vector<64x128xf32>, vector<32x128xf32> -> vector<32x128xf32>
    %7 = arith.addf %3, %6 : vector<32x128xf32>
    %c0_6 = arith.constant 0 : index
    %c0_7 = arith.constant 0 : index
    %8 = vector.load %arg7[%c0_6, %c0_7] : memref<32x128xf32, #tpu.memory_space<vmem>>, vector<32x128xf32>
    tpu.vector_store %arg7[%c0_6, %c0_7], %7 {strides = array<i32>} : memref<32x128xf32, #tpu.memory_space<vmem>>, vector<32x128xf32>,
    %c0_i32_8 = arith.constant 0 : i32
    %9 = arith.cmpi eq, %arg2, %c0_i32_8 : i32
    %10 = arith.extui %9 : i1 to i32
    %c0_i32_9 = arith.constant 0 : i32
    %11 = arith.cmpi ne, %10, %c0_i32_9 : i32
    scf.if %11 {
      %c0_10 = arith.constant 0 : index
      %c0_11 = arith.constant 0 : index
      %12 = vector.load %arg7[%c0_10, %c0_11] : memref<32x128xf32, #tpu.memory_space<vmem>>, vector<32x128xf32>
      %c0_12 = arith.constant 0 : index
      %c0_13 = arith.constant 0 : index
      %13 = vector.load %arg5[%c0_12, %c0_13] : memref<1x128xf32, #tpu.memory_space<vmem>>, vector<1x128xf32>
      %14 = vector.broadcast %13 : vector<1x128xf32> to vector<32x128xf32>
      %15 = arith.addf %12, %14 : vector<32x128xf32>
      %c0_14 = arith.constant 0 : index
      %c0_15 = arith.constant 0 : index
      %16 = vector.load %arg6[%c0_14, %c0_15] : memref<32x128xf32, #tpu.memory_space<vmem>>, vector<32x128xf32>
      tpu.vector_store %arg6[%c0_14, %c0_15], %15 {strides = array<i32>} : memref<32x128xf32, #tpu.memory_space<vmem>>, vector<32x128xf32>,
    } else {
    }
    return
  }
  func.func @transform_0(%arg0: i32, %arg1: i32, %arg2: i32) -> (i32, i32) {
    %c0_i32 = arith.constant 0 : i32
    return %arg0, %arg2 : i32, i32
  }
  func.func @transform_1(%arg0: i32, %arg1: i32, %arg2: i32) -> (i32, i32) {
    %c0_i32 = arith.constant 0 : i32
    return %arg2, %arg1 : i32, i32
  }
  func.func @transform_2(%arg0: i32, %arg1: i32, %arg2: i32) -> (i32, i32) {
    %c0_i32 = arith.constant 0 : i32
    %c0_i32_0 = arith.constant 0 : i32
    return %c0_i32, %arg1 : i32, i32
  }
  func.func @transform_3(%arg0: i32, %arg1: i32, %arg2: i32) -> (i32, i32) {
    %c0_i32 = arith.constant 0 : i32
    return %arg0, %arg1 : i32, i32
  }
}

</mosaic_0001>

<bundles_post_ra>
// kernel: tpu_custom_call.1
= control target key start
LH: loop header
LB: loop body
LE: loop exit
PB: predicated region body
PF: predicated region fallthrough
CT: control target
= control target key end

     0   :  { %8 = vsyncpa [#allocation4], 0  ;;  %s318_s0 = inlined_call_operand.hbm [shape: f32[32,64], index: 0, kind: input, shape index: {}]   ;;  %s319_s1 = inlined_call_operand.hbm [shape: f32[64,128], index: 1, kind: input, shape index: {}]   ;;  %s320_s2 = inlined_call_operand.vmem [shape: f32[1,128], index: 2, kind: input, shape index: {}]   ;;  %s321_s3 = inlined_call_operand.hbm [shape: f32[32,128], index: 3, kind: output, shape index: {}]  }
   0x1   :  { %9 = vsyncpa [#allocation7], 0 }
   0x2   :  { %10 = vsyncpa [#allocation5], 0  ;;  %s15_s14 = sshll.u32 %s318_s0, 4  ;;  %s272_s15 = smov [#allocation3]   ;;  %s16_s14 = int_to_ptr.hbm [resolvable:$true] %s15_s14 }
   0x3   :  { %s17_s16 = sshll.u32 %s272_s15, 4  ;;  %s28_s19 = sshll.u32 %s319_s1, 4  ;;  %s18_s16 = int_to_ptr.vmem [resolvable:$true] %s17_s16  ;;  %s29_s19 = int_to_ptr.hbm [resolvable:$true] %s28_s19 }
   0x4   :  { %s273_s20 = smov 128   ;;  %s274_s21 = smov 8  }
   0x5   :  { %23 = dma.hbm_to_vmem [thread:$0]  %s16_s14, 512, %s18_s16, [#allocation4], %s273_s20, %s273_s20, %s274_s21  }
   0x6   :  { %s275_s22 = smov [#allocation6]  }
   0x7   :  { %s30_s23 = sshll.u32 %s275_s22, 4  ;;  %s31_s23 = int_to_ptr.vmem [resolvable:$true] %s30_s23 }
   0x8   :  { %36 = dma.hbm_to_vmem [thread:$0]  %s29_s19, 1024, %s31_s23, [#allocation7], %s273_s20, %s273_s20, %s274_s21  }
   0x9   :  { %266 = dma.done.wait [#allocation4], 512  }
   0xa   :  { %267 = vsyncadd [#allocation4], 4294966784 }
   0xb   :  { %268 = dma.done.wait [#allocation7], 1024  }
   0xc   :  { %269 = vsyncadd [#allocation7], 4294966272  ;;  %v70_v0 = vld [vmem:[#allocation6 + $0x38] sm:$0xff]  ;;  %v69_v1 = vld [vmem:[#allocation6 + $0x30] sm:$0xff]  ;;  %vm71_vm0 = vcmask 523264   ;;  %s276_s24 = smov [#allocation8]  }
   0xd   :  { %165 = vmatpush.msra.mxu2 %v70_v0  ;;  %166 = vmatpush.msra.mxu3 %v70_v0  ;;  %v68_v2 = vld [vmem:[#allocation6 + $0x28] sm:$0xff]  ;;  %v67_v3 = vld [vmem:[#allocation6 + $0x20] sm:$0xff]  ;;  %v66_v4 = vld [vmem:[#allocation6 + $0x18] sm:$0xff]  ;;  %s144_s25 = sshll.u32 %s276_s24, 4  ;;  %s146_s28 = sshll.u32 %s321_s3, 4  ;;  %s145_s25 = int_to_ptr.vmem [resolvable:$true] %s144_s25  ;;  %s147_s28 = int_to_ptr.hbm [resolvable:$true] %s146_s28 }
   0xe   :  { %92 = vmatpush.msra.mxu0 %v70_v0  ;;  %164 = vmatpush.msra.mxu1 %v70_v0  ;;  %v65_v5 = vld [vmem:[#allocation6 + $0x10] sm:$0xff]  ;;  %v64_v6 = vld [vmem:[#allocation6 + $0x8] sm:$0xff]  ;;  %v63_v7 = vld [vmem:[#allocation6] sm:$0xff] }
   0xf   :  { %168 = vmatpush.msra.mxu2 %v69_v1  ;;  %169 = vmatpush.msra.mxu3 %v69_v1  ;;  %v61_v8 = vld [vmem:[#allocation3 + $0x10] sm:$0xff]  ;;  %v62_v9 = vld [vmem:[#allocation3 + $0x18] sm:$0xff]  ;;  %v59_v10 = vld [vmem:[#allocation3] sm:$0xff] }
  0x10   :  { %93 = vmatpush.msra.mxu0 %v69_v1  ;;  %167 = vmatpush.msra.mxu1 %v69_v1  ;;  %v60_v11 = vld [vmem:[#allocation3 + $0x8] sm:$0xff]  ;;  %v193_v12 = vld [vmem:[%s320_s2] ss:$0 sm:$0xff] }
  0x11   :  { %171 = vmatpush.msra.mxu2 %v68_v2  ;;  %172 = vmatpush.msra.mxu3 %v68_v2 }
  0x12   :  { %94 = vmatpush.msra.mxu0 %v68_v2  ;;  %170 = vmatpush.msra.mxu1 %v68_v2 }
  0x13   :  { %174 = vmatpush.msra.mxu2 %v67_v3  ;;  %175 = vmatpush.msra.mxu3 %v67_v3 }
  0x14   :  { %95 = vmatpush.msra.mxu0 %v67_v3  ;;  %173 = vmatpush.msra.mxu1 %v67_v3 }
  0x15   :  { %177 = vmatpush.msra.mxu2 %v66_v4  ;;  %178 = vmatpush.msra.mxu3 %v66_v4 }
  0x16   :  { %96 = vmatpush.msra.mxu0 %v66_v4  ;;  %176 = vmatpush.msra.mxu1 %v66_v4 }
  0x17   :  { %180 = vmatpush.msra.mxu2 %v65_v5  ;;  %181 = vmatpush.msra.mxu3 %v65_v5 }
  0x18   :  { %97 = vmatpush.msra.mxu0 %v65_v5  ;;  %179 = vmatpush.msra.mxu1 %v65_v5 }
  0x19   :  { %183 = vmatpush.msra.mxu2 %v64_v6  ;;  %184 = vmatpush.msra.mxu3 %v64_v6 }
  0x1a   :  { %98 = vmatpush.msra.mxu0 %v64_v6  ;;  %182 = vmatpush.msra.mxu1 %v64_v6 }
  0x1b   :  { %186 = vmatpush.msra.mxu2 %v63_v7  ;;  %187 = vmatpush.msra.mxu3 %v63_v7 }
  0x1c   :  { %162 = vmatmul.msk.f32.vlgmr.msra.gmra.mxu2 %vm71_vm0, %v61_v8  ;;  %163 = vmatmul.msk.f32.vlgmr.msra.gmra.mxu3 %vm71_vm0, %v62_v9 }
  0x1d   :  { %99 = vmatpush.msra.mxu0 %v63_v7  ;;  %185 = vmatpush.msra.mxu1 %v63_v7 }
  0x1e   :  { %160 = vmatmul.msk.f32.vlgmr.msra.gmra.mxu0 %vm71_vm0, %v59_v10  ;;  %161 = vmatmul.msk.f32.vlgmr.msra.gmra.mxu1 %vm71_vm0, %v60_v11 }
  0x9b   :  { %v101_v13 = vpop.f32.mrf.mxu0  ;;  %v104_v14 = vpop.f32.mrf.mxu1 }
  0x9c   :  { %v132_v15 = vadd.f32 %v193_v12, %v101_v13  ;;  %v133_v16 = vadd.f32 %v193_v12, %v104_v14 }
  0x9e   :  { %136 = vst [vmem:[#allocation8] sm:$0xff] %v132_v15 }
  0x9f   :  { %137 = vst [vmem:[#allocation8 + $0x8] sm:$0xff] %v133_v16  ;;  %v107_v17 = vpop.f32.mrf.mxu2  ;;  %v110_v18 = vpop.f32.mrf.mxu3 }
  0xa0   :  { %v134_v19 = vadd.f32 %v193_v12, %v107_v17  ;;  %v135_v20 = vadd.f32 %v193_v12, %v110_v18 }
  0xa2   :  { %138 = vst [vmem:[#allocation8 + $0x10] sm:$0xff] %v134_v19 }
  0xa3   :  { %139 = vst [vmem:[#allocation8 + $0x18] sm:$0xff] %v135_v20 }
  0xa4   :  { %152 = dma.vmem_to_hbm [thread:$0]  %s145_s25, 512, %s147_s28, [#allocation5], %s273_s20, %s273_s20, %s274_s21  }
  0xa5   :  { %270 = dma.done.wait [#allocation5], 512  }
  0xa6   :  { %271 = vsyncadd [#allocation5], 4294966784 }
  0xa7   :  { %157 = vsyncpa [#allocation4], 1 }
  0xa8   :  { %158 = vsyncpa [#allocation7], 1 }
  0xa9   :  { %159 = vsyncpa [#allocation5], 1 }

</bundles_post_ra>
